<compile_context>
chip_gen: v5e
topology: v5e:2x2
jax: 0.10.0
libtpu: 0.0.40
codegen_flags: <defaults>
</compile_context>

<pallas_src>
import functools

import jax
import jax.numpy as jnp
from jax import lax
from jax.experimental import pallas as pl
from jax.experimental.pallas import tpu as pltpu


def _round_up(x, m):
    return ((x + m - 1) // m) * m


def _choose_ft(F):
    """Lane-dense feature tile width.

    Prefers >= 2 F blocks (so v7x's two TensorCores both get work) while
    keeping FT a multiple of 128 and <= 512.  If F is not a multiple of 128,
    take the whole (un-padded) feature axis as one block instead of padding h.
    """
    if F % 128 != 0:
        return F
    for ft in (512, 384, 256, 128):
        if F % ft == 0 and F // ft >= 2:
            return ft
    return F  # F == 128: single 128-wide block


def _pool_kernel(*args, mode, n_nodes, tile_n, node_chunk, ragged):
    if mode == "mean":
        batch_ref, inv_ref, h_ref, out_ref, acc_ref = args
    else:
        batch_ref, h_ref, out_ref, acc_ref = args
        inv_ref = None

    n = pl.program_id(1)                      # node-tile index (reduction axis, last)
    B, FT = acc_ref.shape
    TN = tile_n

    @pl.when(n == 0)
    def _init():
        init = -jnp.inf if mode == "max" else 0.0
        acc_ref[...] = jnp.full((B, FT), init, dtype=jnp.float32)

    if mode in ("add", "mean"):
        # batch_ref: (1, TN) int32 -> one-hot membership mask, contracted on the MXU.
        batch = batch_ref[...]                                        # (1, TN)
        gids = lax.broadcasted_iota(jnp.int32, (B, TN), 0)            # (B, TN)
        mask_b = gids == batch                                        # (B, TN) bool
        h_tile = h_ref[...]                                           # (TN, FT)
        if ragged:
            # Only emitted when N % TN != 0: mask out-of-range lanes and zero
            # out-of-range rows so garbage (possibly NaN/Inf) in the boundary
            # block cannot contaminate the sum (0 * NaN = NaN otherwise).
            base = n * TN
            lane_idx = lax.broadcasted_iota(jnp.int32, (1, TN), 1)
            mask_b = mask_b & ((base + lane_idx) < n_nodes)
            row_idx = lax.broadcasted_iota(jnp.int32, (TN, 1), 0)
            h_tile = jnp.where((base + row_idx) < n_nodes, h_tile,
                               jnp.zeros_like(h_tile))
        mask = mask_b.astype(h_tile.dtype)                            # cast just before MXU
        acc_ref[...] += jnp.dot(mask, h_tile,
                                preferred_element_type=jnp.float32)   # (B, FT)
    else:  # max — stream 8-row sublane chunks; never build a (B, N, F) tensor.
        base = n * TN

        def body(c, carry):
            lo = pl.multiple_of(c * node_chunk, node_chunk)
            hc = h_ref[pl.ds(lo, node_chunk), :].astype(jnp.float32)      # (nc, FT)
            bc = batch_ref[pl.ds(lo, node_chunk), :]                      # (nc, 1)
            # Build the mask directly in its broadcast shape (B in sublanes),
            # avoiding a per-chunk cross-lane relayout.
            gids = lax.broadcasted_iota(jnp.int32, (node_chunk, B, 1), 1)
            msk = bc[:, :, None] == gids                                  # (nc, B, 1)
            if ragged:
                row = lax.broadcasted_iota(jnp.int32, (node_chunk, 1), 0)
                valid = (base + lo + row) < n_nodes                       # (nc, 1)
                msk = msk & valid[:, :, None]
            masked = jnp.where(msk, hc[:, None, :], -jnp.inf)             # (nc, B, FT)
            acc_ref[...] = jnp.maximum(acc_ref[...], jnp.max(masked, axis=0))
            return carry

        lax.fori_loop(0, TN // node_chunk, body, 0, unroll=2)

    @pl.when(n == pl.num_programs(1) - 1)
    def _finalize():
        if mode == "mean":
            # inv_ref holds 1/max(count,1), precomputed on the wrapper side.
            out_ref[...] = (acc_ref[...] * inv_ref[...]).astype(out_ref.dtype)
        else:
            # NOTE: graphs with zero nodes yield -inf in max mode (matches
            # jax.ops.segment_max's identity).
            out_ref[...] = acc_ref[...].astype(out_ref.dtype)


class PoolingAggregator:
    """JAX/Pallas equivalent of the PyTorch PoolingAggregator module."""

    def __init__(self, mode):
        assert mode in ("add", "mean", "max")
        self.mode = mode

    def __call__(self, h, batch, num_graphs):
        N, F = h.shape
        mode = self.mode
        out_dtype = h.dtype
        itemsize = jnp.dtype(h.dtype).itemsize
        node_chunk = 8

        FT = _choose_ft(F)
        B_pad = _round_up(max(int(num_graphs), 1), 8)

        # --- node-tile size: as big as VMEM comfortably allows --------------
        if mode == "max":
            TN = min(1024, _round_up(N, node_chunk))
        else:
            TN = min(1024, _round_up(N, 256))        # multiple of 256 for the MXU contraction
        # Keep the double-buffered h tile within a modest VMEM budget
        # (v7x has 64 MiB physical VMEM; v5e/v6e have 128 MiB).
        while TN > 256 and 2 * TN * FT * itemsize > (16 << 20):
            TN //= 2

        ragged = (N % TN) != 0
        n_blocks = -(-N // TN)
        f_blocks = F // FT

        batch_i32 = batch.astype(jnp.int32)
        if mode == "max":
            batch_in = batch_i32.reshape(N, 1)
            batch_spec = pl.BlockSpec((TN, 1), lambda f, n: (n, 0))
        else:
            batch_in = batch_i32.reshape(1, N)
            batch_spec = pl.BlockSpec((1, TN), lambda f, n: (0, n))

        in_specs = [batch_spec]
        args = [batch_in]
        if mode == "mean":
            counts = jax.ops.segment_sum(jnp.ones((N,), jnp.float32), batch_i32,
                                         num_segments=B_pad)
            inv_cnt = (1.0 / jnp.maximum(counts, 1.0)).reshape(B_pad, 1)
            in_specs.append(pl.BlockSpec((B_pad, 1), lambda f, n: (0, 0)))
            args.append(inv_cnt)
        in_specs.append(pl.BlockSpec((TN, FT), lambda f, n: (n, f)))
        args.append(h)

        # Rough VMEM budget -> scoped limit (stay well under v7x's 64 MiB).
        vmem_est = (2 * TN * FT * itemsize            # double-buffered h tile
                    + 2 * TN * 4                      # double-buffered batch tile
                    + B_pad * FT * 4                  # resident f32 accumulator
                    + 2 * B_pad * FT * itemsize       # double-buffered out block
                    + B_pad * TN * 4                  # one-hot mask intermediate
                    + (node_chunk * B_pad * FT * 4 if mode == "max" else 0))
        vmem_limit = int(min(48 << 20, max(32 << 20, 2 * vmem_est)))

        kernel = functools.partial(_pool_kernel, mode=mode, n_nodes=N, tile_n=TN,
                                   node_chunk=node_chunk, ragged=ragged)

        out = pl.pallas_call(
            kernel,
            out_shape=jax.ShapeDtypeStruct((B_pad, F), out_dtype),
            grid_spec=pltpu.PrefetchScalarGridSpec(
                num_scalar_prefetch=0,
                grid=(f_blocks, n_blocks),            # F parallel first, N reduction last
                in_specs=in_specs,
                out_specs=pl.BlockSpec((B_pad, FT), lambda f, n: (0, f)),
                scratch_shapes=[pltpu.VMEM((B_pad, FT), jnp.float32)],
            ),
            compiler_params=pltpu.CompilerParams(
                dimension_semantics=("parallel", "arbitrary"),
                vmem_limit_bytes=vmem_limit,
            ),
        )(*args)

        return out[:num_graphs, :]


def _reference(h, batch, num_graphs, mode):
    if mode == "add":
        return jax.ops.segment_sum(h, batch, num_segments=num_graphs)
    if mode == "mean":
        s = jax.ops.segment_sum(h, batch, num_segments=num_graphs)
        c = jax.ops.segment_sum(jnp.ones((h.shape[0], 1)), batch, num_segments=num_graphs)
        return s / jnp.maximum(c, 1.0)
    if mode == "max":
        return jax.ops.segment_max(h, batch, num_segments=num_graphs)
    raise ValueError(mode)


if __name__ == "__main__":
    key = jax.random.PRNGKey(0)
    k1, k2 = jax.random.split(key)

    configs = []
    # Small, divisible config: 64 nodes, 32-dim features, 8 graphs (8 nodes each).
    h0 = jax.random.normal(k1, (64, 32), dtype=jnp.float32)
    b0 = jnp.repeat(jnp.arange(8, dtype=jnp.int32), 8)
    configs.append((h0, b0, 8))
    # Ragged / odd-feature config: 100 nodes, 96-dim features, 5 graphs (20 each).
    h1 = jax.random.normal(k2, (100, 96), dtype=jnp.float32)
    b1 = (jnp.arange(100, dtype=jnp.int32) * 5) // 100
    configs.append((h1, b1, 5))

    ok = True
    for h, batch, num_graphs in configs:
        for mode in ("add", "mean", "max"):
            agg = PoolingAggregator(mode)
            out = jax.block_until_ready(agg(h, batch, num_graphs))
            ref = _reference(h, batch, num_graphs, mode)
            if not jnp.allclose(out, ref, atol=1e-5, rtol=1e-5):
                ok = False
                print(f"N={h.shape[0]} F={h.shape[1]} mode={mode} mismatch, "
                      f"max err {float(jnp.max(jnp.abs(out - ref)))}")

    if ok:
        print("KERNEL_OK")
</pallas_src>

<mosaic_0001>
module attributes {stable_mosaic.version = 11 : i64} {
  func.func @_pool_kernel(%arg0: i32, %arg1: i32, %arg2: memref<1x256xi32, #tpu.memory_space<vmem>>, %arg3: memref<256x32xf32, #tpu.memory_space<vmem>>, %arg4: memref<8x32xf32, #tpu.memory_space<vmem>>, %arg5: memref<8x32xf32, #tpu.memory_space<vmem>>) attributes {dimension_semantics = [#tpu.dimension_semantics<parallel>, #tpu.dimension_semantics<arbitrary>], iteration_bounds = array<i64: 1, 1>, scalar_prefetch = 0 : i64, scratch_operands = 1 : i64, tpu.core_type = #tpu.core_type<tc>, window_params = [{transform_indices = @transform_0, window_bounds = array<i64: 1, 256>}, {transform_indices = @transform_1, window_bounds = array<i64: 256, 32>}, {transform_indices = @transform_2, window_bounds = array<i64: 8, 32>}]} {
    %c0_i32 = arith.constant 0 : i32
    %0 = arith.cmpi eq, %arg1, %c0_i32 : i32
    %1 = arith.extui %0 : i1 to i32
    %c0_i32_0 = arith.constant 0 : i32
    %2 = arith.cmpi ne, %1, %c0_i32_0 : i32
    scf.if %2 {
      %cst_12 = arith.constant 0.000000e+00 : f32
      %34 = vector.broadcast %cst_12 : f32 to vector<8x32xf32>
      %c0_13 = arith.constant 0 : index
      %c0_14 = arith.constant 0 : index
      %35 = vector.load %arg5[%c0_13, %c0_14] : memref<8x32xf32, #tpu.memory_space<vmem>>, vector<8x32xf32>
      tpu.vector_store %arg5[%c0_13, %c0_14], %34 {strides = array<i32>} : memref<8x32xf32, #tpu.memory_space<vmem>>, vector<8x32xf32>,
    } else {
    }
    %c0 = arith.constant 0 : index
    %c0_1 = arith.constant 0 : index
    %3 = vector.load %arg2[%c0, %c0_1] : memref<1x256xi32, #tpu.memory_space<vmem>>, vector<1x256xi32>
    %4 = tpu.iota {dimensions = array<i32: 0>} : vector<8x256xi32>
    %5 = vector.broadcast %3 : vector<1x256xi32> to vector<8x256xi32>
    %6 = arith.cmpi eq, %4, %5 : vector<8x256xi32>
    %c0_2 = arith.constant 0 : index
    %c0_3 = arith.constant 0 : index
    %7 = vector.load %arg3[%c0_2, %c0_3] : memref<256x32xf32, #tpu.memory_space<vmem>>, vector<256x32xf32>
    %c256_i32 = arith.constant 256 : i32
    %8 = arith.muli %arg1, %c256_i32 : i32
    %9 = tpu.iota {dimensions = array<i32: 1>} : vector<1x256xi32>
    %10 = vector.broadcast %8 : i32 to vector<1x256xi32>
    %11 = arith.addi %10, %9 : vector<1x256xi32>
    %c64_i32 = arith.constant 64 : i32
    %12 = vector.broadcast %c64_i32 : i32 to vector<1x256xi32>
    %13 = arith.cmpi slt, %11, %12 : vector<1x256xi32>
    %14 = vector.broadcast %13 : vector<1x256xi1> to vector<8x256xi1>
    %15 = arith.andi %6, %14 : vector<8x256xi1>
    %16 = tpu.iota {dimensions = array<i32: 0>} : vector<256x1xi32>
    %17 = vector.broadcast %8 : i32 to vector<256x1xi32>
    %18 = arith.addi %17, %16 : vector<256x1xi32>
    %c64_i32_4 = arith.constant 64 : i32
    %19 = vector.broadcast %c64_i32_4 : i32 to vector<256x1xi32>
    %20 = arith.cmpi slt, %18, %19 : vector<256x1xi32>
    %cst = arith.constant 0.000000e+00 : f32
    %21 = vector.broadcast %cst : f32 to vector<256x32xf32>
    %22 = vector.shape_cast %20 : vector<256x1xi1> to vector<256x1xi1>
    %23 = vector.broadcast %22 : vector<256x1xi1> to vector<256x32xi1>
    %24 = arith.select %23, %7, %21 : vector<256x32xi1>, vector<256x32xf32>
    %25 = arith.extui %15 : vector<8x256xi1> to vector<8x256xi32>
    %26 = arith.sitofp %25 : vector<8x256xi32> to vector<8x256xf32>
    %c0_5 = arith.constant 0 : index
    %c0_6 = arith.constant 0 : index
    %27 = vector.load %arg5[%c0_5, %c0_6] : memref<8x32xf32, #tpu.memory_space<vmem>>, vector<8x32xf32>
    %cst_7 = arith.constant dense<0.000000e+00> : vector<8x32xf32>
    %28 = tpu.matmul %26, %24, %cst_7 {dimension_numbers = #tpu.dot_dimension_numbers<[1], [0], [0], [1], [0, 0, 1, 1], [], []>} : vector<8x256xf32>, vector<256x32xf32>, vector<8x32xf32> -> vector<8x32xf32>
    %29 = arith.addf %27, %28 : vector<8x32xf32>
    %c0_8 = arith.constant 0 : index
    %c0_9 = arith.constant 0 : index
    %30 = vector.load %arg5[%c0_8, %c0_9] : memref<8x32xf32, #tpu.memory_space<vmem>>, vector<8x32xf32>
    tpu.vector_store %arg5[%c0_8, %c0_9], %29 {strides = array<i32>} : memref<8x32xf32, #tpu.memory_space<vmem>>, vector<8x32xf32>,
    %c0_i32_10 = arith.constant 0 : i32
    %31 = arith.cmpi eq, %arg1, %c0_i32_10 : i32
    %32 = arith.extui %31 : i1 to i32
    %c0_i32_11 = arith.constant 0 : i32
    %33 = arith.cmpi ne, %32, %c0_i32_11 : i32
    scf.if %33 {
      %c0_12 = arith.constant 0 : index
      %c0_13 = arith.constant 0 : index
      %34 = vector.load %arg5[%c0_12, %c0_13] : memref<8x32xf32, #tpu.memory_space<vmem>>, vector<8x32xf32>
      %c0_14 = arith.constant 0 : index
      %c0_15 = arith.constant 0 : index
      %35 = vector.load %arg4[%c0_14, %c0_15] : memref<8x32xf32, #tpu.memory_space<vmem>>, vector<8x32xf32>
      tpu.vector_store %arg4[%c0_14, %c0_15], %34 {strides = array<i32>} : memref<8x32xf32, #tpu.memory_space<vmem>>, vector<8x32xf32>,
    } else {
    }
    return
  }
  func.func @transform_0(%arg0: i32, %arg1: i32) -> (i32, i32) {
    %c0_i32 = arith.constant 0 : i32
    %c0_i32_0 = arith.constant 0 : i32
    return %c0_i32, %arg1 : i32, i32
  }
  func.func @transform_1(%arg0: i32, %arg1: i32) -> (i32, i32) {
    %c0_i32 = arith.constant 0 : i32
    return %arg1, %arg0 : i32, i32
  }
  func.func @transform_2(%arg0: i32, %arg1: i32) -> (i32, i32) {
    %c0_i32 = arith.constant 0 : i32
    %c0_i32_0 = arith.constant 0 : i32
    return %c0_i32, %arg0 : i32, i32
  }
}

</mosaic_0001>

<bundles_post_ra>
// kernel: tpu_custom_call.1
= control target key start
LH: loop header
LB: loop body
LE: loop exit
PB: predicated region body
PF: predicated region fallthrough
CT: control target
= control target key end

     0   :  { %vm16_vm0 = vcmask 261120   ;;  %v363_v2 = vmov 0.0   ;;  %v19_v4 = vlaneseq  ;;  %s414_s0 = inlined_call_operand.vmem [shape: s32[1,64], index: 0, kind: input, shape index: {}]   ;;  %s415_s1 = inlined_call_operand.vmem [shape: f32[64,32], index: 1, kind: input, shape index: {}]   ;;  %s416_s2 = inlined_call_operand.hbm [shape: f32[8,32], index: 2, kind: output, shape index: {}]  }
   0x1   :  { %v32_v0 = vld [vmem:[%s415_s1 + $0x38] sm:$0xff]  ;;  %v31_v1 = vld [vmem:[%s415_s1 + $0x30] sm:$0xff]  ;;  %17 = vst.msk [vmem:[#allocation2] sm:$0xff] %vm16_vm0, %v363_v2  ;;  %303 = vmatpush.msra.mxu1 %v363_v2  ;;  %v30_v3 = vld [vmem:[%s415_s1 + $0x28] sm:$0xff] }
   0x2   :  { %276 = vmatpush.msra.mxu0 %v32_v0  ;;  %304 = vmatmul.f32.vlgmr.msra.gmra.mxu1 %v363_v2  ;;  %v18_v5 = vld [vmem:[%s414_s0] sm:$0x3] }
   0x4   :  { %277 = vmatpush.msra.mxu0 %v31_v1 }
   0x5   :  { %7 = vsyncpa [#allocation4], 0  ;;  %v29_v6 = vld [vmem:[%s415_s1 + $0x20] sm:$0xff]  ;;  %v28_v7 = vld [vmem:[%s415_s1 + $0x18] sm:$0xff]  ;;  %v20_v8 = vshrl.u32 %v19_v4, 7  ;;  %v21_v9 = vperm.slane %v18_v5, 0 }
   0x6   :  { %278 = vmatpush.msra.mxu0 %v30_v3  ;;  %v59_v10 = vand.u32 127, %v19_v4  ;;  %v27_v11 = vld [vmem:[%s415_s1 + $0x10] sm:$0xff]  ;;  %v26_v12 = vld [vmem:[%s415_s1 + $0x8] sm:$0xff]  ;;  %v25_v13 = vld [vmem:[%s415_s1] sm:$0xff]  ;;  %v364_v14 = vmov 1.0   ;;  %s365_s26 = smov [#allocation3]  }
   0x7   :  { %vm23_vm1 = vcmp.eq.s32.totalorder %v20_v8, %v21_v9  ;;  %s321_s27 = sshll.u32 %s365_s26, 4  ;;  %s323_s30 = sshll.u32 %s416_s2, 4  ;;  %s322_s27 = int_to_ptr.vmem [resolvable:$true] %s321_s27  ;;  %s324_s30 = int_to_ptr.hbm [resolvable:$true] %s323_s30 }
   0x8   :  { %279 = vmatpush.msra.mxu0 %v29_v6  ;;  %vm64_vm2 = vcmp.lt.s32.totalorder %v59_v10, 64  ;;  %v267_v17 = vld [vmem:[#allocation2] sm:$0xff] }
   0x9   :  { %vm70_vm3 = vmand %vm23_vm1, %vm64_vm2 }
   0xa   :  { %280 = vmatpush.msra.mxu0 %v28_v7 }
   0xc   :  { %281 = vmatpush.msra.mxu0 %v27_v11 }
   0xe   :  { %282 = vmatpush.msra.mxu0 %v26_v12 }
  0x10   :  { %283 = vmatpush.msra.mxu0 %v25_v13 }
  0x11   :  { %333 = vmatmul.msk.f32.vlgmr.msra.gmra.mxu0 %vm70_vm3, %v364_v14 }
  0x7f   :  { %v305_v15 = vpop.f32.mrf.mxu1 }
  0x8e   :  { %v285_v16 = vpop.f32.mrf.mxu0 }
  0x8f   :  { %v306_v18 = vadd.f32 %v305_v15, %v285_v16 }
  0x91   :  { %v308_v19 = vadd.f32 %v306_v18, %v267_v17 }
  0x93   :  { %310 = vst.msk [vmem:[#allocation2] sm:$0xff] %vm16_vm0, %v308_v19 }
  0x9a   :  { %v314_v20 = vld [vmem:[#allocation2] sm:$0xff] }
  0x9b   :  { %315 = vst.msk [vmem:[#allocation3] sm:$0xff] %vm16_vm0, %v314_v20 }
  0x9c   :  { %326 = dma.vmem_to_hbm [thread:$0]  %s322_s27, 128, %s324_s30, [#allocation4]  }
  0x9d   :  { %361 = dma.done.wait [#allocation4], 128  }
  0x9e   :  { %362 = vsyncadd [#allocation4], 4294967168 }
  0x9f   :  { %331 = vsyncpa [#allocation4], 1 }

</bundles_post_ra>
